<compile_context>
chip_gen: v5e
topology: v5e:2x2
jax: 0.10.0
libtpu: 0.0.40
codegen_flags: <defaults>
</compile_context>

<pallas_src>
import functools
import math

import jax
import jax.numpy as jnp
from jax.experimental import pallas as pl
from jax.experimental.pallas import tpu as pltpu

LANE = 128  # TPU lane width


def _round_up(x, m):
    return (x + m - 1) // m * m


# ----------------------------- Pallas kernel -------------------------------

def dueling_dqn_kernel(x_ref, w1_ref, b1_ref, w2_ref, b2_ref, out_ref, *,
                       n_actions):
    # x_ref : (TB, Dp)    bf16  padded concatenated features
    # w1_ref: (Dp, 2H)    bf16  [advantage_fc1 | value_fc1] fused
    # b1_ref: (1, 2H)     f32
    # w2_ref: (2H, LANE)  bf16  block-diag: adv_fc2 -> lanes [0,A), val_fc2 -> lane A
    # b2_ref: (1, LANE)   f32
    # out_ref:(TB, LANE)  f32   softmax probs live in lanes [0, A)
    x = x_ref[...]

    # Fused first layer of both streams: single MXU pass of width 2H = 256.
    h = jnp.dot(x, w1_ref[...], preferred_element_type=jnp.float32) + b1_ref[...]
    h = jnp.maximum(h, 0.0)                                      # (TB, 2H) f32

    # Fused (block-diagonal) second layer: advan in lanes [0,A), value in lane A.
    y = jnp.dot(h.astype(w2_ref.dtype), w2_ref[...],
                preferred_element_type=jnp.float32) + b2_ref[...]  # (TB, LANE)

    lane = jax.lax.broadcasted_iota(jnp.int32, (1, y.shape[-1]), 1)
    is_action = lane < n_actions
    amask = is_action.astype(jnp.float32)
    vmask = (lane == n_actions).astype(jnp.float32)

    val = jnp.sum(y * vmask, axis=-1, keepdims=True)              # (TB, 1)
    adv_mean = jnp.sum(y * amask, axis=-1, keepdims=True) * (1.0 / n_actions)

    logits = y + val - adv_mean
    logits = jnp.where(is_action, logits, -jnp.inf)               # mask padded lanes

    m = jnp.max(logits, axis=-1, keepdims=True)
    e = jnp.exp(logits - m)
    denom = jnp.sum(e, axis=-1, keepdims=True)
    out_ref[...] = (e * pl.reciprocal(denom, approx=True)).astype(out_ref.dtype)


# ------------------------- host-side weight fusion --------------------------

def fuse_params(params, in_dim, hidden, n_actions):
    """Build fused, padded, bf16 weights from PyTorch-layout (in,out) params."""
    (wa1, ba1, wa2, ba2, wv1, bv1, wv2, bv2) = params
    d_pad = _round_up(in_dim, LANE)

    # Fused fc1: [advantage_fc1 | value_fc1] -> (D_pad, 2H)
    w1 = jnp.zeros((d_pad, 2 * hidden), jnp.float32)
    w1 = w1.at[:in_dim, :hidden].set(wa1)
    w1 = w1.at[:in_dim, hidden:].set(wv1)
    b1 = jnp.concatenate([ba1, bv1]).reshape(1, 2 * hidden).astype(jnp.float32)

    # Fused fc2 (block-diagonal) into a lane-dense (2H, 128) slab.
    w2 = jnp.zeros((2 * hidden, LANE), jnp.float32)
    w2 = w2.at[:hidden, :n_actions].set(wa2)
    w2 = w2.at[hidden:, n_actions:n_actions + 1].set(wv2)
    b2 = jnp.zeros((LANE,), jnp.float32)
    b2 = b2.at[:n_actions].set(ba2)
    b2 = b2.at[n_actions].set(bv2[0])
    b2 = b2.reshape(1, LANE)

    return (w1.astype(jnp.bfloat16), b1, w2.astype(jnp.bfloat16), b2, d_pad)


# ------------------------------ forward wrapper ------------------------------

def dueling_dqn_forward(x, fused, *, n_actions, tile_b=128):
    """x: (B, D) batch of concatenated inputs (or (D,) for a single one).
    Returns (B, n_actions) softmax action distributions (or (n_actions,))."""
    w1, b1, w2, b2, d_pad = fused
    single = (x.ndim == 1)
    if single:
        x = x.reshape(1, -1)
    b, d = x.shape
    b_pad = _round_up(max(b, tile_b), tile_b)

    # Pad batch and feature dims to lane/sublane-friendly sizes; cast to bf16.
    xp = jnp.zeros((b_pad, d_pad), jnp.float32).at[:b, :d].set(x)
    xp = xp.astype(jnp.bfloat16)

    kernel = functools.partial(dueling_dqn_kernel, n_actions=n_actions)
    out = pl.pallas_call(
        kernel,
        out_shape=jax.ShapeDtypeStruct((b_pad, LANE), jnp.float32),
        grid=(b_pad // tile_b,),
        in_specs=[
            pl.BlockSpec((tile_b, d_pad), lambda i: (i, 0)),
            pl.BlockSpec((d_pad, w1.shape[1]), lambda i: (0, 0)),
            pl.BlockSpec((1, b1.shape[1]), lambda i: (0, 0)),
            pl.BlockSpec((w2.shape[0], LANE), lambda i: (0, 0)),
            pl.BlockSpec((1, LANE), lambda i: (0, 0)),
        ],
        out_specs=pl.BlockSpec((tile_b, LANE), lambda i: (i, 0)),
        compiler_params=pltpu.CompilerParams(
            dimension_semantics=("parallel",)),
    )(xp, w1, b1, w2, b2)

    probs = out[:b, :n_actions]
    return probs.reshape(-1) if single else probs


# --------------------------- parameter creation -----------------------------

def make_linear(key, fan_in, fan_out):
    """Deterministic PyTorch-style Linear init, stored as (in, out) / (out,)."""
    kw, kb = jax.random.split(key)
    bound = 1.0 / math.sqrt(fan_in)
    w = jax.random.uniform(kw, (fan_in, fan_out), jnp.float32, -bound, bound)
    b = jax.random.uniform(kb, (fan_out,), jnp.float32, -bound, bound)
    return w, b


# ------------------------------ pure-JAX reference ---------------------------

def reference_forward(x, fused, n_actions):
    """Same math as the kernel (bf16 weights/acts, f32 accumulation)."""
    w1, b1, w2, b2, d_pad = fused
    b, d = x.shape
    xp = jnp.zeros((b, d_pad), jnp.float32).at[:, :d].set(x)
    xp = xp.astype(jnp.bfloat16).astype(jnp.float32)
    h = jnp.maximum(xp @ w1.astype(jnp.float32) + b1, 0.0)
    h = h.astype(jnp.bfloat16).astype(jnp.float32)
    y = h @ w2.astype(jnp.float32) + b2
    adv = y[:, :n_actions]
    val = y[:, n_actions:n_actions + 1]
    logits = val + (adv - jnp.mean(adv, axis=-1, keepdims=True))
    return jax.nn.softmax(logits, axis=-1)


# --------------------------------- main -------------------------------------

if __name__ == "__main__":
    # Small synthetic args consistent with the module.
    neighbors_num = 4
    task_em_size = 8
    device_num = 2
    batch = 4                                          # observation sets

    e_dim = neighbors_num * 3 + 3                      # 15
    in_dim = (e_dim + task_em_size) * device_num       # 46
    hidden = 128
    n_actions = neighbors_num + 1                      # 5

    key = jax.random.PRNGKey(0)
    k_obs, k_a1, k_a2, k_v1, k_v2 = jax.random.split(key, 5)

    # Parameters (only layers used in forward()).
    wa1, ba1 = make_linear(k_a1, in_dim, hidden)       # advantage_fc1
    wa2, ba2 = make_linear(k_a2, hidden, n_actions)    # advantage_fc2
    wv1, bv1 = make_linear(k_v1, in_dim, hidden)       # value_fc1
    wv2, bv2 = make_linear(k_v2, hidden, 1)            # value_fc2
    params = (wa1, ba1, wa2, ba2, wv1, bv1, wv2, bv2)
    fused = fuse_params(params, in_dim, hidden, n_actions)

    # Build `batch` observation lists o = [(e_i, k_i)] * device_num, then do
    # the stack/reshape/concat glue in plain JAX (matches the PyTorch forward).
    ke, kk = jax.random.split(k_obs)
    e_obs = jax.random.normal(ke, (batch, device_num, e_dim), jnp.float32)
    k_obs_ = jax.random.normal(kk, (batch, device_num, task_em_size), jnp.float32)

    rows = []
    for bidx in range(batch):
        o = [(e_obs[bidx, i], k_obs_[bidx, i]) for i in range(device_num)]
        e_flat = jnp.stack([ob[0] for ob in o]).reshape(-1)
        k_flat = jnp.stack([ob[1] for ob in o]).reshape(-1)
        rows.append(jnp.concatenate([e_flat, k_flat], axis=-1))     # (46,)
    x_batch = jnp.stack(rows)                                       # (4, 46)

    probs = dueling_dqn_forward(x_batch, fused, n_actions=n_actions)
    probs = jax.block_until_ready(probs)

    # Correctness checks.
    assert probs.shape == (batch, n_actions)
    ref = reference_forward(x_batch, fused, n_actions)
    assert jnp.allclose(probs, ref, atol=2e-3, rtol=2e-2), (
        f"max err {float(jnp.max(jnp.abs(probs - ref)))}")
    row_sums = jnp.sum(probs, axis=-1)
    assert bool(jnp.all(jnp.abs(row_sums - 1.0) < 1e-2))

    print("KERNEL_OK")
</pallas_src>

<mosaic_0001>
module attributes {stable_mosaic.version = 11 : i64} {
  func.func @dueling_dqn_kernel(%arg0: i32, %arg1: memref<128x128xbf16, #tpu.memory_space<vmem>>, %arg2: memref<128x256xbf16, #tpu.memory_space<vmem>>, %arg3: memref<1x256xf32, #tpu.memory_space<vmem>>, %arg4: memref<256x128xbf16, #tpu.memory_space<vmem>>, %arg5: memref<1x128xf32, #tpu.memory_space<vmem>>, %arg6: memref<128x128xf32, #tpu.memory_space<vmem>>) attributes {dimension_semantics = [#tpu.dimension_semantics<parallel>], iteration_bounds = array<i64: 1>, scalar_prefetch = 0 : i64, scratch_operands = 0 : i64, tpu.core_type = #tpu.core_type<tc>, window_params = [{transform_indices = @transform_0, window_bounds = array<i64: 128, 128>}, {pipeline_mode = #tpu.pipeline_mode<synchronous>, transform_indices = @transform_1, window_bounds = array<i64: 128, 256>}, {pipeline_mode = #tpu.pipeline_mode<synchronous>, transform_indices = @transform_2, window_bounds = array<i64: 1, 256>}, {pipeline_mode = #tpu.pipeline_mode<synchronous>, transform_indices = @transform_3, window_bounds = array<i64: 256, 128>}, {pipeline_mode = #tpu.pipeline_mode<synchronous>, transform_indices = @transform_4, window_bounds = array<i64: 1, 128>}, {transform_indices = @transform_5, window_bounds = array<i64: 128, 128>}]} {
    %c0 = arith.constant 0 : index
    %c0_0 = arith.constant 0 : index
    %0 = vector.load %arg1[%c0, %c0_0] : memref<128x128xbf16, #tpu.memory_space<vmem>>, vector<128x128xbf16>
    %c0_1 = arith.constant 0 : index
    %c0_2 = arith.constant 0 : index
    %1 = vector.load %arg2[%c0_1, %c0_2] : memref<128x256xbf16, #tpu.memory_space<vmem>>, vector<128x256xbf16>
    %cst = arith.constant dense<0.000000e+00> : vector<128x256xf32>
    %2 = tpu.matmul %0, %1, %cst {dimension_numbers = #tpu.dot_dimension_numbers<[1], [0], [0], [1], [0, 0, 1, 1], [], []>} : vector<128x128xbf16>, vector<128x256xbf16>, vector<128x256xf32> -> vector<128x256xf32>
    %c0_3 = arith.constant 0 : index
    %c0_4 = arith.constant 0 : index
    %3 = vector.load %arg3[%c0_3, %c0_4] : memref<1x256xf32, #tpu.memory_space<vmem>>, vector<1x256xf32>
    %4 = vector.broadcast %3 : vector<1x256xf32> to vector<128x256xf32>
    %5 = arith.addf %2, %4 : vector<128x256xf32>
    %cst_5 = arith.constant 0.000000e+00 : f32
    %6 = vector.broadcast %cst_5 : f32 to vector<128x256xf32>
    %7 = arith.maximumf %5, %6 : vector<128x256xf32>
    %8 = arith.truncf %7 : vector<128x256xf32> to vector<128x256xbf16>
    %c0_6 = arith.constant 0 : index
    %c0_7 = arith.constant 0 : index
    %9 = vector.load %arg4[%c0_6, %c0_7] : memref<256x128xbf16, #tpu.memory_space<vmem>>, vector<256x128xbf16>
    %cst_8 = arith.constant dense<0.000000e+00> : vector<128x128xf32>
    %10 = tpu.matmul %8, %9, %cst_8 {dimension_numbers = #tpu.dot_dimension_numbers<[1], [0], [0], [1], [0, 0, 1, 1], [], []>} : vector<128x256xbf16>, vector<256x128xbf16>, vector<128x128xf32> -> vector<128x128xf32>
    %c0_9 = arith.constant 0 : index
    %c0_10 = arith.constant 0 : index
    %11 = vector.load %arg5[%c0_9, %c0_10] : memref<1x128xf32, #tpu.memory_space<vmem>>, vector<1x128xf32>
    %12 = vector.broadcast %11 : vector<1x128xf32> to vector<128x128xf32>
    %13 = arith.addf %10, %12 : vector<128x128xf32>
    %14 = tpu.iota {dimensions = array<i32: 1>} : vector<1x128xi32>
    %c5_i32 = arith.constant 5 : i32
    %15 = vector.broadcast %c5_i32 : i32 to vector<1x128xi32>
    %16 = arith.cmpi slt, %14, %15 : vector<1x128xi32>
    %17 = arith.extui %16 : vector<1x128xi1> to vector<1x128xi32>
    %18 = arith.sitofp %17 : vector<1x128xi32> to vector<1x128xf32>
    %c5_i32_11 = arith.constant 5 : i32
    %19 = vector.broadcast %c5_i32_11 : i32 to vector<1x128xi32>
    %20 = arith.cmpi eq, %14, %19 : vector<1x128xi32>
    %21 = arith.extui %20 : vector<1x128xi1> to vector<1x128xi32>
    %22 = arith.sitofp %21 : vector<1x128xi32> to vector<1x128xf32>
    %23 = vector.broadcast %22 : vector<1x128xf32> to vector<128x128xf32>
    %24 = arith.mulf %13, %23 : vector<128x128xf32>
    %cst_12 = arith.constant dense<0.000000e+00> : vector<128xf32>
    %25 = vector.multi_reduction <add>, %24, %cst_12 [1] : vector<128x128xf32> to vector<128xf32>
    %26 = vector.shape_cast %25 : vector<128xf32> to vector<128x1xf32>
    %27 = vector.broadcast %18 : vector<1x128xf32> to vector<128x128xf32>
    %28 = arith.mulf %13, %27 : vector<128x128xf32>
    %cst_13 = arith.constant dense<0.000000e+00> : vector<128xf32>
    %29 = vector.multi_reduction <add>, %28, %cst_13 [1] : vector<128x128xf32> to vector<128xf32>
    %30 = vector.shape_cast %29 : vector<128xf32> to vector<128x1xf32>
    %cst_14 = arith.constant 2.000000e-01 : f32
    %31 = vector.broadcast %cst_14 : f32 to vector<128x1xf32>
    %32 = arith.mulf %30, %31 : vector<128x1xf32>
    %33 = vector.broadcast %26 : vector<128x1xf32> to vector<128x128xf32>
    %34 = arith.addf %13, %33 : vector<128x128xf32>
    %35 = vector.broadcast %32 : vector<128x1xf32> to vector<128x128xf32>
    %36 = arith.subf %34, %35 : vector<128x128xf32>
    %cst_15 = arith.constant 0xFF800000 : f32
    %37 = vector.shape_cast %16 : vector<1x128xi1> to vector<1x128xi1>
    %38 = vector.broadcast %37 : vector<1x128xi1> to vector<128x128xi1>
    %39 = vector.broadcast %cst_15 : f32 to vector<128x128xf32>
    %40 = arith.select %38, %36, %39 : vector<128x128xi1>, vector<128x128xf32>
    %cst_16 = arith.constant dense<0xFF800000> : vector<128xf32>
    %41 = vector.multi_reduction <maximumf>, %40, %cst_16 [1] : vector<128x128xf32> to vector<128xf32>
    %42 = vector.shape_cast %41 : vector<128xf32> to vector<128x1xf32>
    %43 = vector.broadcast %42 : vector<128x1xf32> to vector<128x128xf32>
    %44 = arith.subf %40, %43 : vector<128x128xf32>
    %45 = math.exp %44 : vector<128x128xf32>
    %cst_17 = arith.constant dense<0.000000e+00> : vector<128xf32>
    %46 = vector.multi_reduction <add>, %45, %cst_17 [1] : vector<128x128xf32> to vector<128xf32>
    %47 = vector.shape_cast %46 : vector<128xf32> to vector<128x1xf32>
    %48 = tpu.reciprocal %47 {approx = true} : vector<128x1xf32> -> vector<128x1xf32>
    %49 = vector.broadcast %48 : vector<128x1xf32> to vector<128x128xf32>
    %50 = arith.mulf %45, %49 : vector<128x128xf32>
    %c0_18 = arith.constant 0 : index
    %c0_19 = arith.constant 0 : index
    %51 = vector.load %arg6[%c0_18, %c0_19] : memref<128x128xf32, #tpu.memory_space<vmem>>, vector<128x128xf32>
    tpu.vector_store %arg6[%c0_18, %c0_19], %50 {strides = array<i32>} : memref<128x128xf32, #tpu.memory_space<vmem>>, vector<128x128xf32>,
    return
  }
  func.func @transform_0(%arg0: i32) -> (i32, i32) {
    %c0_i32 = arith.constant 0 : i32
    %c0_i32_0 = arith.constant 0 : i32
    return %arg0, %c0_i32 : i32, i32
  }
  func.func @transform_1(%arg0: i32) -> (i32, i32) {
    %c0_i32 = arith.constant 0 : i32
    %c0_i32_0 = arith.constant 0 : i32
    %c0_i32_1 = arith.constant 0 : i32
    return %c0_i32, %c0_i32_0 : i32, i32
  }
  func.func @transform_2(%arg0: i32) -> (i32, i32) {
    %c0_i32 = arith.constant 0 : i32
    %c0_i32_0 = arith.constant 0 : i32
    %c0_i32_1 = arith.constant 0 : i32
    return %c0_i32, %c0_i32_0 : i32, i32
  }
  func.func @transform_3(%arg0: i32) -> (i32, i32) {
    %c0_i32 = arith.constant 0 : i32
    %c0_i32_0 = arith.constant 0 : i32
    %c0_i32_1 = arith.constant 0 : i32
    return %c0_i32, %c0_i32_0 : i32, i32
  }
  func.func @transform_4(%arg0: i32) -> (i32, i32) {
    %c0_i32 = arith.constant 0 : i32
    %c0_i32_0 = arith.constant 0 : i32
    %c0_i32_1 = arith.constant 0 : i32
    return %c0_i32, %c0_i32_0 : i32, i32
  }
  func.func @transform_5(%arg0: i32) -> (i32, i32) {
    %c0_i32 = arith.constant 0 : i32
    %c0_i32_0 = arith.constant 0 : i32
    return %arg0, %c0_i32 : i32, i32
  }
}

</mosaic_0001>

<bundles_post_ra>
// kernel: tpu_custom_call.1
= control target key start
LH: loop header
LB: loop body
LE: loop exit
PB: predicated region body
PF: predicated region fallthrough
CT: control target
= control target key end

     0   :  { %10 = vsyncpa [#allocation3], 0  ;;  %s1779_s0 = inlined_call_operand.hbm [shape: bf16[128,128], index: 0, kind: input, shape index: {}]   ;;  %s1780_s1 = inlined_call_operand.hbm [shape: bf16[128,256], index: 1, kind: input, shape index: {}]   ;;  %s1781_s2 = inlined_call_operand.hbm [shape: f32[1,256], index: 2, kind: input, shape index: {}]   ;;  %s1782_s3 = inlined_call_operand.hbm [shape: bf16[256,128], index: 3, kind: input, shape index: {}]   ;;  %s1783_s4 = inlined_call_operand.vmem [shape: f32[1,128], index: 4, kind: input, shape index: {}]   ;;  %s1784_s5 = inlined_call_operand.hbm [shape: f32[128,128], index: 5, kind: output, shape index: {}]  }
   0x1   :  { %11 = vsyncpa [#allocation6], 0 }
   0x2   :  { %12 = vsyncpa [#allocation9], 0  ;;  %s31_s20 = sshll.u32 %s1780_s1, 4  ;;  %s32_s20 = int_to_ptr.hbm [resolvable:$true] %s31_s20 }
   0x3   :  { %13 = vsyncpa [#allocation4], 0  ;;  %s1379_s21 = smov [#allocation5]   ;;  %s18_s25 = sshll.u32 %s1779_s0, 4  ;;  %s19_s25 = int_to_ptr.hbm [resolvable:$true] %s18_s25 }
   0x4   :  { %s33_s22 = sshll.u32 %s1379_s21, 4  ;;  %s1380_s26 = smov 128   ;;  %s34_s22 = int_to_ptr.vmem [resolvable:$true] %s33_s22 }
   0x5   :  { %s1381_s27 = smov 8   ;;  %s1382_s28 = smov [#allocation2]  }
   0x6   :  { %39 = dma.hbm_to_vmem [thread:$0]  %s32_s20, 2048, %s34_s22, [#allocation6], %s1380_s26, %s1380_s26, %s1381_s27  }
   0x7   :  { %s20_s29 = sshll.u32 %s1382_s28, 4  ;;  %s1383_s1 = smov 64   ;;  %s21_s29 = int_to_ptr.vmem [resolvable:$true] %s20_s29 }
   0x8   :  { %s1384_s30 = smov 4   ;;  %s45_s8 = sshll.u32 %s1781_s2, 4  ;;  %s46_s8 = int_to_ptr.hbm [resolvable:$true] %s45_s8 }
   0x9   :  { %26 = dma.hbm_to_vmem [thread:$0]  %s19_s25, 1024, %s21_s29, [#allocation3], %s1383_s1, %s1383_s1, %s1384_s30  }
   0xa   :  { %s1385_s9 = smov [#allocation7]   ;;  %s55_s12 = sshll.u32 %s1782_s3, 4  ;;  %s56_s12 = int_to_ptr.hbm [resolvable:$true] %s55_s12 }
   0xb   :  { %s47_s0 = sshll.u32 %s1385_s9, 4  ;;  %s1386_s13 = smov [#allocation8]   ;;  %s48_s0 = int_to_ptr.vmem [resolvable:$true] %s47_s0 }
   0xc   :  { %50 = dma.hbm_to_vmem [thread:$0]  %s46_s8, 32, %s48_s0, [#allocation6]  }
   0xd   :  { %s57_s14 = sshll.u32 %s1386_s13, 4  ;;  %s58_s14 = int_to_ptr.vmem [resolvable:$true] %s57_s14 }
   0xe   :  { %63 = dma.hbm_to_vmem [thread:$0]  %s56_s12, 2048, %s58_s14, [#allocation9], %s1383_s1, %s1383_s1, %s1384_s30  }
   0xf   :  { %1371 = dma.done.wait [#allocation3], 1024  }
  0x10   :  { %1372 = vsyncadd [#allocation3], 4294966272 }
  0x11   :  { %1373 = dma.done.wait [#allocation6], 2080  }
  0x12   :  { %1374 = vsyncadd [#allocation6], 4294965216 }
  0x13   :  { %1375 = dma.done.wait [#allocation9], 2048  }
  0x14   :  { %1376 = vsyncadd [#allocation9], 4294965248  ;;  %v1064_v0 = vld [vmem:[#allocation5 + $0x70] sm:$0xf]  ;;  %v1159_v1 = vld [vmem:[#allocation5 + $0x74] sm:$0xf0] }
  0x15   :  { %v1158_v2 = vld [vmem:[#allocation5 + $0x74] sm:$0xf]  ;;  %v1065_v3 = vor.u32 %v1159_v1, %v1064_v0  ;;  %v1066_v4 = vld [vmem:[#allocation5 + $0x78] sm:$0xf0]  ;;  %v1056_v5 = vld [vmem:[#allocation5 + $0x60] sm:$0xf] }
  0x16   :  { %v1157_v6 = vld [vmem:[#allocation5 + $0x64] sm:$0xf0]  ;;  %v1069_v7 = vor.u32 %v1158_v2, %v1066_v4  ;;  %v1156_v8 = vld [vmem:[#allocation5 + $0x64] sm:$0xf]  ;;  %v1058_v9 = vld [vmem:[#allocation5 + $0x68] sm:$0xf0] }
  0x17   :  { %248 = vmatpush.bf16.msra.mxu0 %v1065_v3  ;;  %v1057_v10 = vor.u32 %v1157_v6, %v1056_v5  ;;  %v1061_v11 = vor.u32 %v1156_v8, %v1058_v9  ;;  %v1048_v12 = vld [vmem:[#allocation5 + $0x50] sm:$0xf]  ;;  %v1155_v13 = vld [vmem:[#allocation5 + $0x54] sm:$0xf0]  ;;  %v1154_v14 = vld [vmem:[#allocation5 + $0x54] sm:$0xf] }
  0x18   :  { %297 = vmatpush.bf16.msra.mxu1 %v1069_v7  ;;  %v1050_v15 = vld [vmem:[#allocation5 + $0x58] sm:$0xf0]  ;;  %v1049_v16 = vor.u32 %v1155_v13, %v1048_v12  ;;  %v1040_v18 = vld [vmem:[#allocation5 + $0x40] sm:$0xf]  ;;  %v1153_v19 = vld [vmem:[#allocation5 + $0x44] sm:$0xf0] }
  0x19   :  { %v1053_v17 = vor.u32 %v1154_v14, %v1050_v15  ;;  %v1152_v20 = vld [vmem:[#allocation5 + $0x44] sm:$0xf]  ;;  %v1042_v21 = vld [vmem:[#allocation5 + $0x48] sm:$0xf0]  ;;  %v1041_v22 = vor.u32 %v1153_v19, %v1040_v18  ;;  %v1032_v24 = vld [vmem:[#allocation5 + $0x30] sm:$0xf] }
  0x1a   :  { %v1045_v23 = vor.u32 %v1152_v20, %v1042_v21  ;;  %v1151_v25 = vld [vmem:[#allocation5 + $0x34] sm:$0xf0]  ;;  %v1150_v26 = vld [vmem:[#allocation5 + $0x34] sm:$0xf]  ;;  %v1034_v27 = vld [vmem:[#allocation5 + $0x38] sm:$0xf0] }
  0x1b   :  { %249 = vmatpush.bf16.msra.mxu0 %v1057_v10  ;;  %v1033_v28 = vor.u32 %v1151_v25, %v1032_v24  ;;  %v1037_v29 = vor.u32 %v1150_v26, %v1034_v27  ;;  %v1024_v30 = vld [vmem:[#allocation5 + $0x20] sm:$0xf]  ;;  %v1149_v31 = vld [vmem:[#allocation5 + $0x24] sm:$0xf0]  ;;  %v1148_v32 = vld [vmem:[#allocation5 + $0x24] sm:$0xf] }
  0x1c   :  { %298 = vmatpush.bf16.msra.mxu1 %v1061_v11  ;;  %v1026_v33 = vld [vmem:[#allocation5 + $0x28] sm:$0xf0]  ;;  %v1025_v34 = vor.u32 %v1149_v31, %v1024_v30  ;;  %v1016_v36 = vld [vmem:[#allocation5 + $0x10] sm:$0xf]  ;;  %v1147_v37 = vld [vmem:[#allocation5 + $0x14] sm:$0xf0] }
  0x1d   :  { %v1029_v35 = vor.u32 %v1148_v32, %v1026_v33  ;;  %v1146_v38 = vld [vmem:[#allocation5 + $0x14] sm:$0xf]  ;;  %v1018_v39 = vld [vmem:[#allocation5 + $0x18] sm:$0xf0]  ;;  %v1017_v40 = vor.u32 %v1147_v37, %v1016_v36  ;;  %v1008_v42 = vld [vmem:[#allocation5] sm:$0xf] }
  0x1e   :  { %v1021_v41 = vor.u32 %v1146_v38, %v1018_v39  ;;  %v1145_v43 = vld [vmem:[#allocation5 + $0x4] sm:$0xf0]  ;;  %v1144_v44 = vld [vmem:[#allocation5 + $0x4] sm:$0xf]  ;;  %v1010_v45 = vld [vmem:[#allocation5 + $0x8] sm:$0xf0] }
  0x1f   :  { %250 = vmatpush.bf16.msra.mxu0 %v1049_v16  ;;  %v1009_v46 = vor.u32 %v1145_v43, %v1008_v42  ;;  %v1013_v47 = vor.u32 %v1144_v44, %v1010_v45  ;;  %v1136_v48 = vld [vmem:[#allocation2] sm:$0xff]  ;;  %v1137_v49 = vld [vmem:[#allocation2 + $0x8] sm:$0xff]  ;;  %v1138_v50 = vld [vmem:[#allocation2 + $0x10] sm:$0xff]  ;;  %s959_s18 = sshll.u32 %s1784_s5, 4  ;;  %s960_s18 = int_to_ptr.hbm [resolvable:$true] %s959_s18 }
  0x20   :  { %299 = vmatpush.bf16.msra.mxu1 %v1053_v17  ;;  %v1139_v51 = vld [vmem:[#allocation2 + $0x18] sm:$0xff]  ;;  %v1140_v52 = vld [vmem:[#allocation2 + $0x20] sm:$0xff]  ;;  %v1141_v55 = vld [vmem:[#allocation2 + $0x28] sm:$0xff] }
  0x21   :  { %v1167_v53 = vld [vmem:[#allocation8 + $0x38] sm:$0xff]  ;;  %v1166_v56 = vld [vmem:[#allocation8 + $0x30] sm:$0xff]  ;;  %v1165_v58 = vld [vmem:[#allocation8 + $0x28] sm:$0xff] }
  0x22   :  { %v1175_v54 = vld [vmem:[#allocation8 + $0x78] sm:$0xff]  ;;  %526 = vmatpush.bf16.msra.mxu2 %v1167_v53  ;;  %v1174_v57 = vld [vmem:[#allocation8 + $0x70] sm:$0xff]  ;;  %v1173_v59 = vld [vmem:[#allocation8 + $0x68] sm:$0xff] }
  0x23   :  { %251 = vmatpush.bf16.msra.mxu0 %v1041_v22  ;;  %575 = vmatpush.bf16.msra.mxu3 %v1175_v54  ;;  %v1164_v60 = vld [vmem:[#allocation8 + $0x20] sm:$0xff]  ;;  %v1142_v62 = vld [vmem:[#allocation2 + $0x30] sm:$0xff]  ;;  %v1163_v63 = vld [vmem:[#allocation8 + $0x18] sm:$0xff] }
  0x24   :  { %300 = vmatpush.bf16.msra.mxu1 %v1045_v23  ;;  %v1172_v61 = vld [vmem:[#allocation8 + $0x60] sm:$0xff]  ;;  %v1171_v0 = vld [vmem:[#allocation8 + $0x58] sm:$0xff]  ;;  %v1162_v1 = vld [vmem:[#allocation8 + $0x10] sm:$0xff] }
  0x25   :  { %v1170_v2 = vld [vmem:[#allocation8 + $0x50] sm:$0xff]  ;;  %v1161_v3 = vld [vmem:[#allocation8 + $0x8] sm:$0xff]  ;;  %v1160_v5 = vld [vmem:[#allocation8] sm:$0xff] }
  0x26   :  { %527 = vmatpush.bf16.msra.mxu2 %v1166_v56  ;;  %v1169_v4 = vld [vmem:[#allocation8 + $0x48] sm:$0xff]  ;;  %v1168_v6 = vld [vmem:[#allocation8 + $0x40] sm:$0xff]  ;;  %v1143_v7 = vld [vmem:[#allocation2 + $0x38] sm:$0xff] }
  0x27   :  { %252 = vmatpush.bf16.msra.mxu0 %v1033_v28  ;;  %576 = vmatpush.bf16.msra.mxu3 %v1174_v57  ;;  %v114_v8 = vld [vmem:[#allocation7] sm:$0x3] }
  0x28   :  { %301 = vmatpush.bf16.msra.mxu1 %v1037_v29  ;;  %v1434_v11 = vperm.slane %v114_v8, 0  ;;  %v1436_v12 = vperm.slane %v114_v8, 1 }
  0x2a   :  { %528 = vmatpush.bf16.msra.mxu2 %v1165_v58 }
  0x2b   :  { %253 = vmatpush.bf16.msra.mxu0 %v1025_v34  ;;  %577 = vmatpush.bf16.msra.mxu3 %v1173_v59 }
  0x2c   :  { %302 = vmatpush.bf16.msra.mxu1 %v1029_v35 }
  0x2e   :  { %529 = vmatpush.bf16.msra.mxu2 %v1164_v60 }
  0x2f   :  { %254 = vmatpush.bf16.msra.mxu0 %v1017_v40  ;;  %578 = vmatpush.bf16.msra.mxu3 %v1172_v61 }
  0x30   :  { %303 = vmatpush.bf16.msra.mxu1 %v1021_v41 }
  0x32   :  { %530 = vmatpush.bf16.msra.mxu2 %v1163_v63 }
  0x33   :  { %255 = vmatpush.bf16.msra.mxu0 %v1009_v46  ;;  %579 = vmatpush.bf16.msra.mxu3 %v1171_v0 }
  0x34   :  { %304 = vmatpush.bf16.msra.mxu1 %v1013_v47 }
  0x36   :  { %256 = vmatmul.bf16.vlgmr.msra.gmra.mxu0 %v1136_v48  ;;  %531 = vmatpush.bf16.msra.mxu2 %v1162_v1 }
  0x37   :  { %305 = vmatmul.bf16.vlgmr.msra.gmra.mxu1 %v1136_v48  ;;  %580 = vmatpush.bf16.msra.mxu3 %v1170_v2 }
  0x3a   :  { %532 = vmatpush.bf16.msra.mxu2 %v1161_v3 }
  0x3b   :  { %581 = vmatpush.bf16.msra.mxu3 %v1169_v4 }
  0x3e   :  { %533 = vmatpush.bf16.msra.mxu2 %v1160_v5 }
  0x3f   :  { %582 = vmatpush.bf16.msra.mxu3 %v1168_v6 }
  0x46   :  { %261 = vmatmul.bf16.gmra.mxu0 %v1137_v49 }
  0x47   :  { %310 = vmatmul.bf16.gmra.mxu1 %v1137_v49 }
  0x56   :  { %266 = vmatmul.bf16.gmra.mxu0 %v1138_v50 }
  0x57   :  { %315 = vmatmul.bf16.gmra.mxu1 %v1138_v50 }
  0x66   :  { %271 = vmatmul.bf16.gmra.mxu0 %v1139_v51 }
  0x67   :  { %320 = vmatmul.bf16.gmra.mxu1 %v1139_v51 }
  0x76   :  { %276 = vmatmul.bf16.gmra.mxu0 %v1140_v52 }
  0x77   :  { %325 = vmatmul.bf16.gmra.mxu1 %v1140_v52 }
  0x86   :  { %281 = vmatmul.bf16.gmra.mxu0 %v1141_v55 }
  0x87   :  { %330 = vmatmul.bf16.gmra.mxu1 %v1141_v55 }
  0x96   :  { %286 = vmatmul.bf16.gmra.mxu0 %v1142_v62 }
  0x97   :  { %335 = vmatmul.bf16.gmra.mxu1 %v1142_v62 }
  0xa6   :  { %291 = vmatmul.bf16.gmra.mxu0 %v1143_v7 }
  0xa7   :  { %340 = vmatmul.bf16.gmra.mxu1 %v1143_v7 }
  0xb3   :  { %v257_v9 = vpop.f32.mrf.mxu0 }
  0xb4   :  { %v306_v10 = vpop.f32.mrf.mxu1  ;;  %v258_v13 = vadd.f32 %v257_v9, %v1434_v11 }
  0xb5   :  { %v307_v14 = vadd.f32 %v306_v10, %v1436_v12 }
  0xb6   :  { %v346_v19 = vmax.f32 %v258_v13, 0.0 }
  0xb7   :  { %v347_v21 = vmax.f32 %v307_v14, 0.0 }
  0xbb   :  { %v259_v15 = vpop.f32.mrf.mxu0 }
  0xbc   :  { %v260_v16 = vadd.f32 %v259_v15, %v1434_v11  ;;  %v308_v17 = vpop.f32.mrf.mxu1 }
  0xbd   :  { %v309_v18 = vadd.f32 %v308_v17, %v1436_v12 }
  0xbe   :  { %v348_v20 = vmax.f32 %v260_v16, 0.0 }
  0xbf   :  { %v349_v22 = vmax.f32 %v309_v18, 0.0 }
  0xc0   :  { %v378_v23 = vpack.c.bf16 %v348_v20, %v346_v19 }
  0xc1   :  { %v379_v24 = vpack.c.bf16 %v349_v22, %v347_v21 }
  0xc2   :  { %534 = vmatmul.bf16.vlgmr.msra.gmra.mxu2 %v378_v23 }
  0xc3   :  { %583 = vmatmul.bf16.vlgmr.msra.gmra.mxu3 %v379_v24  ;;  %v262_v25 = vpop.f32.mrf.mxu0 }
  0xc4   :  { %v311_v26 = vpop.f32.mrf.mxu1  ;;  %v263_v27 = vadd.f32 %v262_v25, %v1434_v11 }
  0xc5   :  { %v312_v28 = vadd.f32 %v311_v26, %v1436_v12 }
  0xc6   :  { %v350_v33 = vmax.f32 %v263_v27, 0.0 }
  0xc7   :  { %v351_v35 = vmax.f32 %v312_v28, 0.0 }
  0xcb   :  { %v264_v29 = vpop.f32.mrf.mxu0 }
  0xcc   :  { %v265_v30 = vadd.f32 %v264_v29, %v1434_v11  ;;  %v313_v31 = vpop.f32.mrf.mxu1 }
  0xcd   :  { %v314_v32 = vadd.f32 %v313_v31, %v1436_v12 }
  0xce   :  { %v352_v34 = vmax.f32 %v265_v30, 0.0 }
  0xcf   :  { %v353_v36 = vmax.f32 %v314_v32, 0.0 }
  0xd0   :  { %v380_v37 = vpack.c.bf16 %v352_v34, %v350_v33 }
  0xd1   :  { %v381_v38 = vpack.c.bf16 %v353_v36, %v351_v35 }
  0xd2   :  { %539 = vmatmul.bf16.gmra.mxu2 %v380_v37 }
  0xd3   :  { %588 = vmatmul.bf16.gmra.mxu3 %v381_v38  ;;  %v267_v39 = vpop.f32.mrf.mxu0 }
  0xd4   :  { %v316_v40 = vpop.f32.mrf.mxu1  ;;  %v268_v41 = vadd.f32 %v267_v39, %v1434_v11 }
  0xd5   :  { %v317_v42 = vadd.f32 %v316_v40, %v1436_v12 }
  0xd6   :  { %v354_v47 = vmax.f32 %v268_v41, 0.0 }
  0xd7   :  { %v355_v49 = vmax.f32 %v317_v42, 0.0 }
  0xdb   :  { %v269_v43 = vpop.f32.mrf.mxu0 }
  0xdc   :  { %v270_v44 = vadd.f32 %v269_v43, %v1434_v11  ;;  %v318_v45 = vpop.f32.mrf.mxu1 }
  0xdd   :  { %v319_v46 = vadd.f32 %v318_v45, %v1436_v12 }
  0xde   :  { %v356_v48 = vmax.f32 %v270_v44, 0.0 }
  0xdf   :  { %v357_v50 = vmax.f32 %v319_v46, 0.0 }
  0xe0   :  { %v382_v51 = vpack.c.bf16 %v356_v48, %v354_v47 }
  0xe1   :  { %v383_v52 = vpack.c.bf16 %v357_v50, %v355_v49 }
  0xe2   :  { %544 = vmatmul.bf16.gmra.mxu2 %v382_v51 }
  0xe3   :  { %593 = vmatmul.bf16.gmra.mxu3 %v383_v52  ;;  %v272_v53 = vpop.f32.mrf.mxu0 }
  0xe4   :  { %v321_v54 = vpop.f32.mrf.mxu1  ;;  %v273_v55 = vadd.f32 %v272_v53, %v1434_v11 }
  0xe5   :  { %v322_v56 = vadd.f32 %v321_v54, %v1436_v12 }
  0xe6   :  { %v358_v61 = vmax.f32 %v273_v55, 0.0 }
  0xe7   :  { %v359_v63 = vmax.f32 %v322_v56, 0.0 }
  0xeb   :  { %v274_v57 = vpop.f32.mrf.mxu0 }
  0xec   :  { %v275_v58 = vadd.f32 %v274_v57, %v1434_v11  ;;  %v323_v59 = vpop.f32.mrf.mxu1 }
  0xed   :  { %v324_v60 = vadd.f32 %v323_v59, %v1436_v12 }
  0xee   :  { %v360_v62 = vmax.f32 %v275_v58, 0.0 }
  0xef   :  { %v361_v0 = vmax.f32 %v324_v60, 0.0 }
  0xf0   :  { %v384_v1 = vpack.c.bf16 %v360_v62, %v358_v61  ;;  %v624_v61 = vlaneseq }
  0xf1   :  { %v385_v2 = vpack.c.bf16 %v361_v0, %v359_v63  ;;  %v1475_v63 = vld [vmem:[%s1783_s4] ss:$0 sm:$0xff]  ;;  %s1388_s4 = smov [#allocation10]  }
  0xf2   :  { %549 = vmatmul.bf16.gmra.mxu2 %v384_v1  ;;  %v1470_v62 = vand.u32 127, %v624_v61  ;;  %v1387_v1 = vmov 0.0   ;;  %s957_s15 = sshll.u32 %s1388_s4, 4  ;;  %s958_s15 = int_to_ptr.vmem [resolvable:$true] %s957_s15 }
  0xf3   :  { %598 = vmatmul.bf16.gmra.mxu3 %v385_v2  ;;  %v277_v3 = vpop.f32.mrf.mxu0 }
  0xf4   :  { %v326_v4 = vpop.f32.mrf.mxu1  ;;  %v278_v5 = vadd.f32 %v277_v3, %v1434_v11  ;;  %vm626_vm0 = vcmp.lt.s32.totalorder %v1470_v62, 5  ;;  %vm629_vm1 = vcmp.eq.s32.totalorder %v1470_v62, 5 }
  0xf5   :  { %v327_v6 = vadd.f32 %v326_v4, %v1436_v12  ;;  %v1482_v2 = vsel %vm626_vm0, 1.0, %v1387_v1  ;;  %v1484_v3 = vsel %vm629_vm1, 1.0, %v1387_v1 }
  0xf6   :  { %v362_v13 = vmax.f32 %v278_v5, 0.0 }
  0xf7   :  { %v363_v15 = vmax.f32 %v327_v6, 0.0 }
  0xfb   :  { %v279_v7 = vpop.f32.mrf.mxu0 }
  0xfc   :  { %v280_v8 = vadd.f32 %v279_v7, %v1434_v11  ;;  %v328_v9 = vpop.f32.mrf.mxu1 }
  0xfd   :  { %v329_v10 = vadd.f32 %v328_v9, %v1436_v12 }
  0xfe   :  { %v364_v14 = vmax.f32 %v280_v8, 0.0 }
  0xff   :  { %v365_v16 = vmax.f32 %v329_v10, 0.0 }
 0x100   :  { %v386_v17 = vpack.c.bf16 %v364_v14, %v362_v13 }
 0x101   :  { %v387_v18 = vpack.c.bf16 %v365_v16, %v363_v15 }
 0x102   :  { %554 = vmatmul.bf16.gmra.mxu2 %v386_v17 }
 0x103   :  { %603 = vmatmul.bf16.gmra.mxu3 %v387_v18  ;;  %v282_v19 = vpop.f32.mrf.mxu0 }
 0x104   :  { %v331_v20 = vpop.f32.mrf.mxu1  ;;  %v283_v21 = vadd.f32 %v282_v19, %v1434_v11 }
 0x105   :  { %v332_v22 = vadd.f32 %v331_v20, %v1436_v12 }
 0x106   :  { %v366_v27 = vmax.f32 %v283_v21, 0.0 }
 0x107   :  { %v367_v29 = vmax.f32 %v332_v22, 0.0 }
 0x10b   :  { %v284_v23 = vpop.f32.mrf.mxu0 }
 0x10c   :  { %v285_v24 = vadd.f32 %v284_v23, %v1434_v11  ;;  %v333_v25 = vpop.f32.mrf.mxu1 }
 0x10d   :  { %v334_v26 = vadd.f32 %v333_v25, %v1436_v12 }
 0x10e   :  { %v368_v28 = vmax.f32 %v285_v24, 0.0 }
 0x10f   :  { %v369_v30 = vmax.f32 %v334_v26, 0.0 }
 0x110   :  { %v388_v31 = vpack.c.bf16 %v368_v28, %v366_v27 }
 0x111   :  { %v389_v32 = vpack.c.bf16 %v369_v30, %v367_v29 }
 0x112   :  { %559 = vmatmul.bf16.gmra.mxu2 %v388_v31 }
 0x113   :  { %608 = vmatmul.bf16.gmra.mxu3 %v389_v32  ;;  %v287_v33 = vpop.f32.mrf.mxu0 }
 0x114   :  { %v336_v34 = vpop.f32.mrf.mxu1  ;;  %v288_v35 = vadd.f32 %v287_v33, %v1434_v11 }
 0x115   :  { %v337_v36 = vadd.f32 %v336_v34, %v1436_v12 }
 0x116   :  { %v370_v41 = vmax.f32 %v288_v35, 0.0 }
 0x117   :  { %v371_v43 = vmax.f32 %v337_v36, 0.0 }
 0x11b   :  { %v289_v37 = vpop.f32.mrf.mxu0 }
 0x11c   :  { %v290_v38 = vadd.f32 %v289_v37, %v1434_v11  ;;  %v338_v39 = vpop.f32.mrf.mxu1 }
 0x11d   :  { %v339_v40 = vadd.f32 %v338_v39, %v1436_v12 }
 0x11e   :  { %v372_v42 = vmax.f32 %v290_v38, 0.0 }
 0x11f   :  { %v373_v44 = vmax.f32 %v339_v40, 0.0 }
 0x120   :  { %v390_v45 = vpack.c.bf16 %v372_v42, %v370_v41 }
 0x121   :  { %v391_v46 = vpack.c.bf16 %v373_v44, %v371_v43 }
 0x122   :  { %564 = vmatmul.bf16.gmra.mxu2 %v390_v45 }
 0x123   :  { %613 = vmatmul.bf16.gmra.mxu3 %v391_v46  ;;  %v292_v47 = vpop.f32.mrf.mxu0 }
 0x124   :  { %v341_v48 = vpop.f32.mrf.mxu1  ;;  %v293_v49 = vadd.f32 %v292_v47, %v1434_v11 }
 0x125   :  { %v342_v50 = vadd.f32 %v341_v48, %v1436_v12 }
 0x126   :  { %v374_v55 = vmax.f32 %v293_v49, 0.0 }
 0x127   :  { %v375_v57 = vmax.f32 %v342_v50, 0.0 }
 0x12b   :  { %v294_v51 = vpop.f32.mrf.mxu0 }
 0x12c   :  { %v295_v52 = vadd.f32 %v294_v51, %v1434_v11  ;;  %v343_v53 = vpop.f32.mrf.mxu1 }
 0x12d   :  { %v344_v54 = vadd.f32 %v343_v53, %v1436_v12 }
 0x12e   :  { %v376_v56 = vmax.f32 %v295_v52, 0.0 }
 0x12f   :  { %v377_v58 = vmax.f32 %v344_v54, 0.0 }
 0x130   :  { %v392_v59 = vpack.c.bf16 %v376_v56, %v374_v55 }
 0x131   :  { %v393_v60 = vpack.c.bf16 %v377_v58, %v375_v57 }
 0x132   :  { %569 = vmatmul.bf16.gmra.mxu2 %v392_v59 }
 0x133   :  { %618 = vmatmul.bf16.gmra.mxu3 %v393_v60 }
 0x145   :  { %v535_v11 = vpop.f32.mrf.mxu2 }
 0x146   :  { %v536_v12 = vadd.f32 %v1475_v63, %v535_v11  ;;  %v584_v0 = vpop.f32.mrf.mxu3 }
 0x148   :  { %v1486_v4 = vadd.f32 %v584_v0, %v536_v12 }
 0x14a   :  { %v680_v5 = vmul.f32 %v1482_v2, %v1486_v4  ;;  %v632_v6 = vmul.f32 %v1484_v3, %v1486_v4 }
 0x14c   :  { %696 = vadd.xlane.f32.xlu1 %v680_v5  ;;  %648 = vadd.xlane.f32.xlu0 %v632_v6 }
 0x14d   :  { %v537_v7 = vpop.f32.mrf.mxu2 }
 0x14e   :  { %v538_v8 = vadd.f32 %v1475_v63, %v537_v7  ;;  %v586_v9 = vpop.f32.mrf.mxu3 }
 0x150   :  { %v1493_v10 = vadd.f32 %v586_v9, %v538_v8 }
 0x152   :  { %v681_v13 = vmul.f32 %v1482_v2, %v1493_v10  ;;  %v633_v14 = vmul.f32 %v1484_v3, %v1493_v10 }
 0x154   :  { %698 = vadd.xlane.f32.xlu2 %v681_v13  ;;  %650 = vadd.xlane.f32.xlu0 %v633_v14 }
 0x155   :  { %v540_v15 = vpop.f32.mrf.mxu2 }
 0x156   :  { %v541_v16 = vadd.f32 %v1475_v63, %v540_v15  ;;  %v589_v17 = vpop.f32.mrf.mxu3 }
 0x158   :  { %v1500_v18 = vadd.f32 %v589_v17, %v541_v16 }
 0x15a   :  { %v634_v19 = vmul.f32 %v1484_v3, %v1500_v18  ;;  %v682_v20 = vmul.f32 %v1482_v2, %v1500_v18 }
 0x15c   :  { %652 = vadd.xlane.f32.xlu1 %v634_v19  ;;  %700 = vadd.xlane.f32.xlu0 %v682_v20 }
 0x15d   :  { %v542_v21 = vpop.f32.mrf.mxu2 }
 0x15e   :  { %v543_v22 = vadd.f32 %v1475_v63, %v542_v21  ;;  %v591_v23 = vpop.f32.mrf.mxu3 }
 0x160   :  { %v1507_v24 = vadd.f32 %v591_v23, %v543_v22 }
 0x162   :  { %v635_v25 = vmul.f32 %v1484_v3, %v1507_v24  ;;  %v683_v31 = vmul.f32 %v1482_v2, %v1507_v24 }
 0x164   :  { %654 = vadd.xlane.f32.xlu1 %v635_v25 }
 0x165   :  { %v545_v26 = vpop.f32.mrf.mxu2 }
 0x166   :  { %v546_v27 = vadd.f32 %v1475_v63, %v545_v26  ;;  %v594_v28 = vpop.f32.mrf.mxu3 }
 0x168   :  { %v1512_v29 = vadd.f32 %v594_v28, %v546_v27 }
 0x16a   :  { %v636_v30 = vmul.f32 %v1484_v3, %v1512_v29  ;;  %v684_v36 = vmul.f32 %v1482_v2, %v1512_v29 }
 0x16c   :  { %656 = vadd.xlane.f32.xlu2 %v636_v30  ;;  %702 = vadd.xlane.f32.xlu1 %v683_v31 }
 0x16d   :  { %v547_v32 = vpop.f32.mrf.mxu2 }
 0x16e   :  { %v548_v33 = vadd.f32 %v1475_v63, %v547_v32  ;;  %v596_v34 = vpop.f32.mrf.mxu3 }
 0x170   :  { %v1519_v35 = vadd.f32 %v596_v34, %v548_v33 }
 0x172   :  { %v685_v37 = vmul.f32 %v1482_v2, %v1519_v35  ;;  %v637_v42 = vmul.f32 %v1484_v3, %v1519_v35 }
 0x174   :  { %704 = vadd.xlane.f32.xlu2 %v684_v36  ;;  %706 = vadd.xlane.f32.xlu0 %v685_v37 }
 0x175   :  { %v550_v38 = vpop.f32.mrf.mxu2 }
 0x176   :  { %v551_v39 = vadd.f32 %v1475_v63, %v550_v38  ;;  %v599_v40 = vpop.f32.mrf.mxu3 }
 0x178   :  { %v1526_v41 = vadd.f32 %v599_v40, %v551_v39 }
 0x17a   :  { %v686_v43 = vmul.f32 %v1482_v2, %v1526_v41  ;;  %v638_v44 = vmul.f32 %v1484_v3, %v1526_v41 }
 0x17c   :  { %658 = vadd.xlane.f32.xlu2 %v637_v42  ;;  %708 = vadd.xlane.f32.xlu1 %v686_v43 }
 0x17d   :  { %660 = vadd.xlane.f32.xlu0 %v638_v44  ;;  %v552_v45 = vpop.f32.mrf.mxu2 }
 0x17e   :  { %v553_v46 = vadd.f32 %v1475_v63, %v552_v45  ;;  %v601_v47 = vpop.f32.mrf.mxu3 }
 0x180   :  { %v1535_v48 = vadd.f32 %v601_v47, %v553_v46 }
 0x182   :  { %v687_v49 = vmul.f32 %v1482_v2, %v1535_v48  ;;  %v639_v50 = vmul.f32 %v1484_v3, %v1535_v48 }
 0x184   :  { %710 = vadd.xlane.f32.xlu2 %v687_v49  ;;  %662 = vadd.xlane.f32.xlu1 %v639_v50 }
 0x185   :  { %v555_v51 = vpop.f32.mrf.mxu2 }
 0x186   :  { %v556_v52 = vadd.f32 %v1475_v63, %v555_v51  ;;  %v604_v53 = vpop.f32.mrf.mxu3 }
 0x188   :  { %v1542_v54 = vadd.f32 %v604_v53, %v556_v52 }
 0x18a   :  { %v640_v55 = vmul.f32 %v1484_v3, %v1542_v54  ;;  %v688_v56 = vmul.f32 %v1482_v2, %v1542_v54 }
 0x18c   :  { %664 = vadd.xlane.f32.xlu2 %v640_v55  ;;  %712 = vadd.xlane.f32.xlu0 %v688_v56 }
 0x18d   :  { %v557_v57 = vpop.f32.mrf.mxu2 }
 0x18e   :  { %v558_v58 = vadd.f32 %v1475_v63, %v557_v57  ;;  %v606_v59 = vpop.f32.mrf.mxu3 }
 0x190   :  { %v1549_v60 = vadd.f32 %v606_v59, %v558_v58 }
 0x192   :  { %v689_v61 = vmul.f32 %v1482_v2, %v1549_v60  ;;  %v641_v11 = vmul.f32 %v1484_v3, %v1549_v60 }
 0x194   :  { %714 = vadd.xlane.f32.xlu1 %v689_v61  ;;  %666 = vadd.xlane.f32.xlu0 %v641_v11 }
 0x195   :  { %v560_v12 = vpop.f32.mrf.mxu2 }
 0x196   :  { %v561_v0 = vadd.f32 %v1475_v63, %v560_v12  ;;  %v609_v1 = vpop.f32.mrf.mxu3 }
 0x198   :  { %v1556_v5 = vadd.f32 %v609_v1, %v561_v0 }
 0x19a   :  { %v690_v6 = vmul.f32 %v1482_v2, %v1556_v5  ;;  %v642_v7 = vmul.f32 %v1484_v3, %v1556_v5 }
 0x19c   :  { %716 = vadd.xlane.f32.xlu2 %v690_v6  ;;  %668 = vadd.xlane.f32.xlu1 %v642_v7 }
 0x19d   :  { %v562_v8 = vpop.f32.mrf.mxu2 }
 0x19e   :  { %v563_v9 = vadd.f32 %v1475_v63, %v562_v8  ;;  %v611_v13 = vpop.f32.mrf.mxu3 }
 0x1a0   :  { %v1563_v14 = vadd.f32 %v611_v13, %v563_v9 }
 0x1a2   :  { %v643_v15 = vmul.f32 %v1484_v3, %v1563_v14  ;;  %v691_v16 = vmul.f32 %v1482_v2, %v1563_v14 }
 0x1a4   :  { %670 = vadd.xlane.f32.xlu2 %v643_v15  ;;  %718 = vadd.xlane.f32.xlu0 %v691_v16 }
 0x1a5   :  { %v565_v17 = vpop.f32.mrf.mxu2 }
 0x1a6   :  { %v566_v19 = vadd.f32 %v1475_v63, %v565_v17  ;;  %v614_v20 = vpop.f32.mrf.mxu3 }
 0x1a8   :  { %v1570_v21 = vadd.f32 %v614_v20, %v566_v19 }
 0x1aa   :  { %v692_v22 = vmul.f32 %v1482_v2, %v1570_v21  ;;  %v644_v23 = vmul.f32 %v1484_v3, %v1570_v21 }
 0x1ac   :  { %720 = vadd.xlane.f32.xlu1 %v692_v22  ;;  %672 = vadd.xlane.f32.xlu0 %v644_v23 }
 0x1ad   :  { %v567_v25 = vpop.f32.mrf.mxu2 }
 0x1ae   :  { %v568_v26 = vadd.f32 %v1475_v63, %v567_v25  ;;  %v616_v27 = vpop.f32.mrf.mxu3 }
 0x1b0   :  { %v1577_v28 = vadd.f32 %v616_v27, %v568_v26 }
 0x1b2   :  { %v693_v30 = vmul.f32 %v1482_v2, %v1577_v28  ;;  %v645_v31 = vmul.f32 %v1484_v3, %v1577_v28 }
 0x1b4   :  { %722 = vadd.xlane.f32.xlu2 %v693_v30  ;;  %674 = vadd.xlane.f32.xlu1 %v645_v31 }
 0x1b5   :  { %v570_v32 = vpop.f32.mrf.mxu2 }
 0x1b6   :  { %v571_v33 = vadd.f32 %v1475_v63, %v570_v32  ;;  %v619_v34 = vpop.f32.mrf.mxu3 }
 0x1b8   :  { %v1584_v36 = vadd.f32 %v619_v34, %v571_v33 }
 0x1ba   :  { %v646_v37 = vmul.f32 %v1484_v3, %v1584_v36 }
 0x1bc   :  { %676 = vadd.xlane.f32.xlu2 %v646_v37 }
 0x1bd   :  { %v572_v38 = vpop.f32.mrf.mxu2 }
 0x1be   :  { %v573_v39 = vadd.f32 %v1475_v63, %v572_v38  ;;  %v621_v40 = vpop.f32.mrf.mxu3 }
 0x1bf   :  { %v697_v42 = vpop.xlane.xlu1 %696  ;;  %v649_v43 = vpop.xlane.xlu0 %648 }
 0x1c0   :  { %v1589_v44 = vadd.f32 %v621_v40, %v573_v39  ;;  %v728_v45 = vmul.f32 0.2, %v697_v42  ;;  %v744_v46 = vadd.f32 %v649_v43, %v1486_v4  ;;  %v694_v4 = vmul.f32 %v1482_v2, %v1584_v36 }
 0x1c2   :  { %v695_v47 = vmul.f32 %v1482_v2, %v1589_v44  ;;  %v647_v49 = vmul.f32 %v1484_v3, %v1589_v44  ;;  %v760_v50 = vsub.f32 %v744_v46, %v728_v45 }
 0x1c4   :  { %726 = vadd.xlane.f32.xlu1 %v695_v47  ;;  %678 = vadd.xlane.f32.xlu0 %v647_v49  ;;  %v1598_v63 = vsel %vm626_vm0, %v760_v50, -inf }
 0x1c5   :  { %793 = vmax.xlane.f32.xlu2 %v1598_v63 }
 0x1c7   :  { %v651_v51 = vpop.xlane.xlu0 %650  ;;  %v699_v52 = vpop.xlane.xlu2 %698 }
 0x1c8   :  { %v729_v53 = vmul.f32 0.2, %v699_v52  ;;  %v745_v55 = vadd.f32 %v651_v51, %v1493_v10 }
 0x1ca   :  { %v761_v57 = vsub.f32 %v745_v55, %v729_v53 }
 0x1cc   :  { %724 = vadd.xlane.f32.xlu0 %v694_v4  ;;  %v1607_v11 = vsel %vm626_vm0, %v761_v57, -inf }
 0x1cf   :  { %v653_v56 = vpop.xlane.xlu1 %652  ;;  %v701_v3 = vpop.xlane.xlu0 %700 }
 0x1d0   :  { %v746_v58 = vadd.f32 %v653_v56, %v1500_v18  ;;  %v730_v59 = vmul.f32 0.2, %v701_v3 }
 0x1d2   :  { %v762_v61 = vsub.f32 %v746_v58, %v730_v59 }
 0x1d4   :  { %795 = vmax.xlane.f32.xlu0 %v1607_v11  ;;  %v1612_v2 = vsel %vm626_vm0, %v762_v61, -inf }
 0x1d5   :  { %797 = vmax.xlane.f32.xlu1 %v1612_v2 }
 0x1d7   :  { %v655_v10 = vpop.xlane.xlu1 %654 }
 0x1d8   :  { %v747_v1 = vadd.f32 %v655_v10, %v1507_v24 }
 0x1df   :  { %v657_v12 = vpop.xlane.xlu2 %656  ;;  %v703_v0 = vpop.xlane.xlu1 %702 }
 0x1e0   :  { %v731_v18 = vmul.f32 0.2, %v703_v0  ;;  %v748_v13 = vadd.f32 %v657_v12, %v1512_v29 }
 0x1e2   :  { %v763_v6 = vsub.f32 %v747_v1, %v731_v18 }
 0x1e4   :  { %v1618_v7 = vsel %vm626_vm0, %v763_v6, -inf }
 0x1e5   :  { %799 = vmax.xlane.f32.xlu2 %v1618_v7 }
 0x1e7   :  { %v705_v8 = vpop.xlane.xlu2 %704  ;;  %v707_v9 = vpop.xlane.xlu0 %706 }
 0x1e8   :  { %v732_v15 = vmul.f32 0.2, %v705_v8  ;;  %v733_v20 = vmul.f32 0.2, %v707_v9 }
 0x1ea   :  { %v764_v16 = vsub.f32 %v748_v13, %v732_v15 }
 0x1ec   :  { %v1624_v17 = vsel %vm626_vm0, %v764_v16, -inf }
 0x1ed   :  { %801 = vmax.xlane.f32.xlu0 %v1624_v17 }
 0x1ef   :  { %v659_v24 = vpop.xlane.xlu2 %658  ;;  %v709_v19 = vpop.xlane.xlu1 %708 }
 0x1f0   :  { %v749_v22 = vadd.f32 %v659_v24, %v1519_v35  ;;  %v734_v23 = vmul.f32 0.2, %v709_v19  ;;  %v661_v25 = vpop.xlane.xlu0 %660 }
 0x1f1   :  { %v750_v26 = vadd.f32 %v661_v25, %v1526_v41 }
 0x1f2   :  { %v765_v27 = vsub.f32 %v749_v22, %v733_v20 }
 0x1f3   :  { %v766_v30 = vsub.f32 %v750_v26, %v734_v23 }
 0x1f4   :  { %v1631_v29 = vsel %vm626_vm0, %v765_v27, -inf }
 0x1f5   :  { %803 = vmax.xlane.f32.xlu1 %v1631_v29  ;;  %v1636_v31 = vsel %vm626_vm0, %v766_v30, -inf }
 0x1f6   :  { %805 = vmax.xlane.f32.xlu2 %v1636_v31 }
 0x1f7   :  { %v711_v32 = vpop.xlane.xlu2 %710  ;;  %v663_v35 = vpop.xlane.xlu1 %662 }
 0x1f8   :  { %v735_v33 = vmul.f32 0.2, %v711_v32  ;;  %v751_v34 = vadd.f32 %v663_v35, %v1535_v48 }
 0x1fa   :  { %v767_v41 = vsub.f32 %v751_v34, %v735_v33 }
 0x1fc   :  { %v1642_v37 = vsel %vm626_vm0, %v767_v41, -inf }
 0x1fd   :  { %807 = vmax.xlane.f32.xlu0 %v1642_v37 }
 0x1ff   :  { %v665_v38 = vpop.xlane.xlu2 %664  ;;  %v713_v39 = vpop.xlane.xlu0 %712 }
 0x200   :  { %v752_v40 = vadd.f32 %v665_v38, %v1542_v54  ;;  %v736_v42 = vmul.f32 0.2, %v713_v39 }
 0x202   :  { %v768_v43 = vsub.f32 %v752_v40, %v736_v42 }
 0x204   :  { %v1648_v45 = vsel %vm626_vm0, %v768_v43, -inf }
 0x205   :  { %809 = vmax.xlane.f32.xlu1 %v1648_v45 }
 0x207   :  { %v715_v48 = vpop.xlane.xlu1 %714  ;;  %v667_v46 = vpop.xlane.xlu0 %666 }
 0x208   :  { %v737_v47 = vmul.f32 0.2, %v715_v48  ;;  %v753_v49 = vadd.f32 %v667_v46, %v1549_v60 }
 0x20a   :  { %v769_v50 = vsub.f32 %v753_v49, %v737_v47 }
 0x20c   :  { %v1654_v51 = vsel %vm626_vm0, %v769_v50, -inf }
 0x20d   :  { %811 = vmax.xlane.f32.xlu2 %v1654_v51 }
 0x20f   :  { %v717_v54 = vpop.xlane.xlu2 %716  ;;  %v669_v52 = vpop.xlane.xlu1 %668 }
 0x210   :  { %v738_v4 = vmul.f32 0.2, %v717_v54  ;;  %v754_v53 = vadd.f32 %v669_v52, %v1556_v5 }
 0x212   :  { %v770_v55 = vsub.f32 %v754_v53, %v738_v4 }
 0x214   :  { %v1660_v56 = vsel %vm626_vm0, %v770_v55, -inf }
 0x215   :  { %813 = vmax.xlane.f32.xlu0 %v1660_v56 }
 0x217   :  { %v671_v60 = vpop.xlane.xlu2 %670  ;;  %v719_v3 = vpop.xlane.xlu0 %718 }
 0x218   :  { %v755_v57 = vadd.f32 %v671_v60, %v1563_v14  ;;  %v739_v58 = vmul.f32 0.2, %v719_v3 }
 0x21a   :  { %v771_v59 = vsub.f32 %v755_v57, %v739_v58 }
 0x21c   :  { %v1666_v61 = vsel %vm626_vm0, %v771_v59, -inf }
 0x21d   :  { %815 = vmax.xlane.f32.xlu1 %v1666_v61 }
 0x21f   :  { %v721_v5 = vpop.xlane.xlu1 %720  ;;  %v673_v10 = vpop.xlane.xlu0 %672 }
 0x220   :  { %v740_v12 = vmul.f32 0.2, %v721_v5  ;;  %v756_v0 = vadd.f32 %v673_v10, %v1570_v21 }
 0x222   :  { %v772_v1 = vsub.f32 %v756_v0, %v740_v12 }
 0x224   :  { %v1672_v18 = vsel %vm626_vm0, %v772_v1, -inf }
 0x225   :  { %817 = vmax.xlane.f32.xlu2 %v1672_v18 }
 0x227   :  { %v723_v14 = vpop.xlane.xlu2 %722  ;;  %v675_v6 = vpop.xlane.xlu1 %674 }
 0x228   :  { %v741_v8 = vmul.f32 0.2, %v723_v14  ;;  %v757_v9 = vadd.f32 %v675_v6, %v1577_v28 }
 0x22a   :  { %v773_v13 = vsub.f32 %v757_v9, %v741_v8 }
 0x22c   :  { %v1678_v15 = vsel %vm626_vm0, %v773_v13, -inf }
 0x22d   :  { %819 = vmax.xlane.f32.xlu0 %v1678_v15 }
 0x22f   :  { %v677_v21 = vpop.xlane.xlu2 %676 }
 0x230   :  { %v758_v30 = vadd.f32 %v677_v21, %v1584_v36 }
 0x237   :  { %v727_v16 = vpop.xlane.xlu1 %726  ;;  %v679_v24 = vpop.xlane.xlu0 %678 }
 0x238   :  { %v743_v19 = vmul.f32 0.2, %v727_v16  ;;  %v759_v20 = vadd.f32 %v679_v24, %v1589_v44  ;;  %v794_v22 = vpop.xlane.xlu2 %793 }
 0x239   :  { %v825_v23 = vsub.f32 %v1598_v63, %v794_v22 }
 0x23a   :  { %v775_v25 = vsub.f32 %v759_v20, %v743_v19 }
 0x23b   :  { %v841_v26 = vmul.f32 1.442695, %v825_v23 }
 0x23c   :  { %v1685_v28 = vsel %vm626_vm0, %v775_v25, -inf }
 0x23d   :  { %1187 = vpow2.f32 %v841_v26  ;;  %823 = vmax.xlane.f32.xlu2 %v1685_v28 }
 0x23f   :  { %v725_v27 = vpop.xlane.xlu0 %724 }
 0x240   :  { %v742_v32 = vmul.f32 0.2, %v725_v27 }
 0x242   :  { %v774_v35 = vsub.f32 %v758_v30, %v742_v32 }
 0x243   :  { %v1689_v33 = vpop.eup %1187 }
 0x244   :  { %873 = vadd.xlane.f32.xlu0 %v1689_v33  ;;  %v1694_v44 = vsel %vm626_vm0, %v774_v35, -inf }
 0x245   :  { %821 = vmax.xlane.f32.xlu1 %v1694_v44 }
 0x247   :  { %v796_v63 = vpop.xlane.xlu0 %795 }
 0x248   :  { %v826_v34 = vsub.f32 %v1607_v11, %v796_v63  ;;  %v798_v41 = vpop.xlane.xlu1 %797 }
 0x249   :  { %v827_v38 = vsub.f32 %v1612_v2, %v798_v41 }
 0x24a   :  { %v843_v39 = vmul.f32 1.442695, %v826_v34 }
 0x24b   :  { %v845_v36 = vmul.f32 1.442695, %v827_v38 }
 0x24c   :  { %1189 = vpow2.f32 %v843_v39 }
 0x24d   :  { %1191 = vpow2.f32 %v845_v36 }
 0x252   :  { %v1699_v40 = vpop.eup %1189 }
 0x253   :  { %v1701_v42 = vpop.eup %1191  ;;  %875 = vadd.xlane.f32.xlu1 %v1699_v40 }
 0x254   :  { %877 = vadd.xlane.f32.xlu2 %v1701_v42 }
 0x258   :  { %v800_v62 = vpop.xlane.xlu2 %799 }
 0x259   :  { %v828_v43 = vsub.f32 %v1618_v7, %v800_v62 }
 0x25b   :  { %v847_v48 = vmul.f32 1.442695, %v828_v43 }
 0x25d   :  { %1193 = vpow2.f32 %v847_v48 }
 0x260   :  { %v802_v11 = vpop.xlane.xlu0 %801 }
 0x261   :  { %v829_v2 = vsub.f32 %v1624_v17, %v802_v11 }
 0x263   :  { %v1707_v46 = vpop.eup %1193  ;;  %v849_v47 = vmul.f32 1.442695, %v829_v2 }
 0x264   :  { %879 = vadd.xlane.f32.xlu0 %v1707_v46 }
 0x265   :  { %1195 = vpow2.f32 %v849_v47 }
 0x268   :  { %v804_v49 = vpop.xlane.xlu1 %803 }
 0x269   :  { %v830_v50 = vsub.f32 %v1631_v29, %v804_v49  ;;  %v806_v54 = vpop.xlane.xlu2 %805 }
 0x26a   :  { %v831_v52 = vsub.f32 %v1636_v31, %v806_v54 }
 0x26b   :  { %v1712_v4 = vpop.eup %1195  ;;  %v851_v7 = vmul.f32 1.442695, %v830_v50 }
 0x26c   :  { %v853_v53 = vmul.f32 1.442695, %v831_v52  ;;  %881 = vadd.xlane.f32.xlu1 %v1712_v4 }
 0x26d   :  { %1197 = vpow2.f32 %v851_v7 }
 0x26e   :  { %1199 = vpow2.f32 %v853_v53 }
 0x270   :  { %v808_v17 = vpop.xlane.xlu0 %807 }
 0x271   :  { %v832_v55 = vsub.f32 %v1642_v37, %v808_v17 }
 0x273   :  { %v1716_v60 = vpop.eup %1197  ;;  %v855_v3 = vmul.f32 1.442695, %v832_v55 }
 0x274   :  { %v1718_v57 = vpop.eup %1199  ;;  %883 = vadd.xlane.f32.xlu2 %v1716_v60 }
 0x275   :  { %1201 = vpow2.f32 %v855_v3  ;;  %885 = vadd.xlane.f32.xlu0 %v1718_v57 }
 0x278   :  { %v810_v29 = vpop.xlane.xlu1 %809 }
 0x279   :  { %v833_v31 = vsub.f32 %v1648_v45, %v810_v29 }
 0x27b   :  { %v1723_v58 = vpop.eup %1201  ;;  %v857_v59 = vmul.f32 1.442695, %v833_v31 }
 0x27c   :  { %887 = vadd.xlane.f32.xlu1 %v1723_v58 }
 0x27d   :  { %1203 = vpow2.f32 %v857_v59 }
 0x280   :  { %v812_v37 = vpop.xlane.xlu2 %811 }
 0x281   :  { %v834_v5 = vsub.f32 %v1654_v51, %v812_v37 }
 0x283   :  { %v1727_v10 = vpop.eup %1203  ;;  %v859_v12 = vmul.f32 1.442695, %v834_v5 }
 0x284   :  { %889 = vadd.xlane.f32.xlu2 %v1727_v10 }
 0x285   :  { %1205 = vpow2.f32 %v859_v12 }
 0x288   :  { %v814_v0 = vpop.xlane.xlu0 %813 }
 0x289   :  { %v835_v1 = vsub.f32 %v1660_v56, %v814_v0 }
 0x28b   :  { %v1731_v14 = vpop.eup %1205  ;;  %v861_v45 = vmul.f32 1.442695, %v835_v1 }
 0x28c   :  { %891 = vadd.xlane.f32.xlu0 %v1731_v14 }
 0x28d   :  { %1207 = vpow2.f32 %v861_v45 }
 0x290   :  { %v816_v6 = vpop.xlane.xlu1 %815 }
 0x291   :  { %v836_v8 = vsub.f32 %v1666_v61, %v816_v6 }
 0x293   :  { %v1735_v9 = vpop.eup %1207  ;;  %v863_v51 = vmul.f32 1.442695, %v836_v8 }
 0x294   :  { %893 = vadd.xlane.f32.xlu1 %v1735_v9 }
 0x295   :  { %1209 = vpow2.f32 %v863_v51 }
 0x298   :  { %v818_v13 = vpop.xlane.xlu2 %817 }
 0x299   :  { %v837_v21 = vsub.f32 %v1672_v18, %v818_v13 }
 0x29b   :  { %v1739_v16 = vpop.eup %1209  ;;  %v865_v56 = vmul.f32 1.442695, %v837_v21 }
 0x29c   :  { %895 = vadd.xlane.f32.xlu2 %v1739_v16 }
 0x29d   :  { %1211 = vpow2.f32 %v865_v56 }
 0x2a0   :  { %v820_v24 = vpop.xlane.xlu0 %819 }
 0x2a1   :  { %v838_v19 = vsub.f32 %v1678_v15, %v820_v24 }
 0x2a3   :  { %v1743_v20 = vpop.eup %1211  ;;  %v867_v61 = vmul.f32 1.442695, %v838_v19 }
 0x2a4   :  { %897 = vadd.xlane.f32.xlu0 %v1743_v20 }
 0x2a5   :  { %1213 = vpow2.f32 %v867_v61 }
 0x2ab   :  { %v1746_v22 = vpop.eup %1213 }
 0x2ac   :  { %899 = vadd.xlane.f32.xlu1 %v1746_v22 }
 0x2b0   :  { %v824_v18 = vpop.xlane.xlu2 %823 }
 0x2b1   :  { %v840_v23 = vsub.f32 %v1685_v28, %v824_v18 }
 0x2b3   :  { %v871_v25 = vmul.f32 1.442695, %v840_v23 }
 0x2b5   :  { %1215 = vpow2.f32 %v871_v25 }
 0x2b7   :  { %v874_v26 = vpop.xlane.xlu0 %873 }
 0x2b8   :  { %1217 = vrcp.f32 %v874_v26  ;;  %v822_v27 = vpop.xlane.xlu1 %821 }
 0x2b9   :  { %v839_v15 = vsub.f32 %v1694_v44, %v822_v27 }
 0x2bb   :  { %v1751_v30 = vpop.eup %1215  ;;  %v869_v32 = vmul.f32 1.442695, %v839_v15 }
 0x2bc   :  { %903 = vadd.xlane.f32.xlu0 %v1751_v30 }
 0x2bd   :  { %1219 = vpow2.f32 %v869_v32 }
 0x2be   :  { %v1218_v35 = vpop.eup %1217 }
 0x2bf   :  { %v921_v63 = vmul.f32 %v1218_v35, %v1689_v33 }
 0x2c1   :  { %937 = vst [vmem:[#allocation10] sm:$0xff] %v921_v63 }
 0x2c3   :  { %v1755_v34 = vpop.eup %1219 }
 0x2c4   :  { %901 = vadd.xlane.f32.xlu2 %v1755_v34 }
 0x2c6   :  { %v876_v28 = vpop.xlane.xlu1 %875 }
 0x2c7   :  { %1221 = vrcp.f32 %v876_v28  ;;  %v878_v41 = vpop.xlane.xlu2 %877 }
 0x2c8   :  { %1223 = vrcp.f32 %v878_v41 }
 0x2cd   :  { %v1222_v38 = vpop.eup %1221 }
 0x2ce   :  { %v1224_v44 = vpop.eup %1223  ;;  %v922_v39 = vmul.f32 %v1222_v38, %v1699_v40 }
 0x2cf   :  { %v923_v36 = vmul.f32 %v1224_v44, %v1701_v42 }
 0x2d0   :  { %938 = vst [vmem:[#allocation10 + $0x8] sm:$0xff] %v922_v39 }
 0x2d1   :  { %939 = vst [vmem:[#allocation10 + $0x10] sm:$0xff] %v923_v36 }
 0x2d7   :  { %v880_v62 = vpop.xlane.xlu0 %879 }
 0x2d8   :  { %1225 = vrcp.f32 %v880_v62 }
 0x2de   :  { %v1226_v33 = vpop.eup %1225 }
 0x2df   :  { %v924_v43 = vmul.f32 %v1226_v33, %v1707_v46  ;;  %v882_v48 = vpop.xlane.xlu1 %881 }
 0x2e0   :  { %1227 = vrcp.f32 %v882_v48 }
 0x2e1   :  { %940 = vst [vmem:[#allocation10 + $0x18] sm:$0xff] %v924_v43 }
 0x2e6   :  { %v1228_v11 = vpop.eup %1227 }
 0x2e7   :  { %v925_v2 = vmul.f32 %v1228_v11, %v1712_v4  ;;  %v884_v47 = vpop.xlane.xlu2 %883 }
 0x2e8   :  { %1229 = vrcp.f32 %v884_v47  ;;  %v886_v49 = vpop.xlane.xlu0 %885 }
 0x2e9   :  { %941 = vst [vmem:[#allocation10 + $0x20] sm:$0xff] %v925_v2  ;;  %1231 = vrcp.f32 %v886_v49 }
 0x2ee   :  { %v1230_v40 = vpop.eup %1229 }
 0x2ef   :  { %v1232_v42 = vpop.eup %1231  ;;  %v926_v50 = vmul.f32 %v1230_v40, %v1716_v60  ;;  %v888_v54 = vpop.xlane.xlu1 %887 }
 0x2f0   :  { %v927_v52 = vmul.f32 %v1232_v42, %v1718_v57  ;;  %1233 = vrcp.f32 %v888_v54 }
 0x2f1   :  { %942 = vst [vmem:[#allocation10 + $0x28] sm:$0xff] %v926_v50 }
 0x2f2   :  { %943 = vst [vmem:[#allocation10 + $0x30] sm:$0xff] %v927_v52 }
 0x2f6   :  { %v1234_v46 = vpop.eup %1233 }
 0x2f7   :  { %v928_v7 = vmul.f32 %v1234_v46, %v1723_v58  ;;  %v890_v53 = vpop.xlane.xlu2 %889 }
 0x2f8   :  { %1235 = vrcp.f32 %v890_v53 }
 0x2f9   :  { %944 = vst [vmem:[#allocation10 + $0x38] sm:$0xff] %v928_v7 }
 0x2fe   :  { %v1236_v4 = vpop.eup %1235 }
 0x2ff   :  { %v929_v17 = vmul.f32 %v1236_v4, %v1727_v10  ;;  %v892_v55 = vpop.xlane.xlu0 %891 }
 0x300   :  { %1237 = vrcp.f32 %v892_v55 }
 0x301   :  { %945 = vst [vmem:[#allocation10 + $0x40] sm:$0xff] %v929_v17 }
 0x306   :  { %v1238_v3 = vpop.eup %1237 }
 0x307   :  { %v930_v60 = vmul.f32 %v1238_v3, %v1731_v14  ;;  %v894_v29 = vpop.xlane.xlu1 %893 }
 0x308   :  { %1239 = vrcp.f32 %v894_v29 }
 0x309   :  { %946 = vst [vmem:[#allocation10 + $0x48] sm:$0xff] %v930_v60 }
 0x30e   :  { %v1240_v57 = vpop.eup %1239 }
 0x30f   :  { %v931_v31 = vmul.f32 %v1240_v57, %v1735_v9  ;;  %v896_v59 = vpop.xlane.xlu2 %895 }
 0x310   :  { %1241 = vrcp.f32 %v896_v59 }
 0x311   :  { %947 = vst [vmem:[#allocation10 + $0x50] sm:$0xff] %v931_v31 }
 0x316   :  { %v1242_v58 = vpop.eup %1241 }
 0x317   :  { %v932_v37 = vmul.f32 %v1242_v58, %v1739_v16  ;;  %v898_v5 = vpop.xlane.xlu0 %897 }
 0x318   :  { %1243 = vrcp.f32 %v898_v5 }
 0x319   :  { %948 = vst [vmem:[#allocation10 + $0x58] sm:$0xff] %v932_v37 }
 0x31e   :  { %v1244_v10 = vpop.eup %1243 }
 0x31f   :  { %v933_v12 = vmul.f32 %v1244_v10, %v1743_v20  ;;  %v900_v0 = vpop.xlane.xlu1 %899 }
 0x320   :  { %1245 = vrcp.f32 %v900_v0 }
 0x321   :  { %949 = vst [vmem:[#allocation10 + $0x60] sm:$0xff] %v933_v12 }
 0x326   :  { %v1246_v1 = vpop.eup %1245 }
 0x327   :  { %v934_v14 = vmul.f32 %v1246_v1, %v1746_v22 }
 0x329   :  { %950 = vst [vmem:[#allocation10 + $0x68] sm:$0xff] %v934_v14 }
 0x32f   :  { %v904_v45 = vpop.xlane.xlu0 %903 }
 0x330   :  { %1247 = vrcp.f32 %v904_v45 }
 0x336   :  { %v1248_v6 = vpop.eup %1247 }
 0x337   :  { %v936_v8 = vmul.f32 %v1248_v6, %v1751_v30  ;;  %v902_v9 = vpop.xlane.xlu2 %901 }
 0x338   :  { %1249 = vrcp.f32 %v902_v9 }
 0x339   :  { %952 = vst [vmem:[#allocation10 + $0x78] sm:$0xff] %v936_v8 }
 0x33e   :  { %v1250_v51 = vpop.eup %1249 }
 0x33f   :  { %v935_v13 = vmul.f32 %v1250_v51, %v1755_v34 }
 0x341   :  { %951 = vst [vmem:[#allocation10 + $0x70] sm:$0xff] %v935_v13 }
 0x342   :  { %965 = dma.vmem_to_hbm [thread:$0]  %s958_s15, 2048, %s960_s18, [#allocation4], %s1380_s26, %s1380_s26, %s1381_s27  }
 0x343   :  { %1377 = dma.done.wait [#allocation4], 2048  }
 0x344   :  { %1378 = vsyncadd [#allocation4], 4294965248 }
 0x345   :  { %970 = vsyncpa [#allocation3], 1 }
 0x346   :  { %971 = vsyncpa [#allocation6], 1 }
 0x347   :  { %972 = vsyncpa [#allocation9], 1 }
 0x348   :  { %973 = vsyncpa [#allocation4], 1 }

</bundles_post_ra>
